<compile_context>
chip_gen: v5e
topology: v5e:2x2
jax: 0.10.0
libtpu: 0.0.40
codegen_flags: <defaults>
</compile_context>

<pallas_src>
import functools

import jax
import jax.numpy as jnp
from jax.experimental import pallas as pl
from jax.experimental.pallas import tpu as pltpu


def _round_up(x: int, m: int) -> int:
    return ((x + m - 1) // m) * m


def _num_tensorcores() -> int:
    """TensorCores per chip: 2 on v7x (and megacore v4/v5p), else 1."""
    try:
        kind = jax.devices()[0].device_kind.lower()
    except Exception:
        return 1
    return 2 if any(tag in kind for tag in ("v7", "v4", "v5p")) else 1


def mlp_kernel(x_ref, w1_ref, b1_ref, w2_ref, b2_ref, w3_ref, b3_ref, o_ref):
    # fc1: bf16 operands on the MXU, f32 accumulation; bias + ReLU in f32.
    h1 = jnp.dot(x_ref[...], w1_ref[...], preferred_element_type=jnp.float32)
    h1 = jnp.maximum(h1 + b1_ref[...], 0.0)
    # fc2
    h2 = jnp.dot(h1.astype(jnp.bfloat16), w2_ref[...],
                 preferred_element_type=jnp.float32)
    h2 = jnp.maximum(h2 + b2_ref[...], 0.0)
    # fc3 (no activation)
    out = jnp.dot(h2.astype(jnp.bfloat16), w3_ref[...],
                  preferred_element_type=jnp.float32) + b3_ref[...]
    o_ref[...] = out.astype(o_ref.dtype)


def prepare_params(params):
    """One-time padding + bf16 cast of the weights (hoisted out of forward).

    Only the hidden / output lane dims are padded to multiples of 128 so all
    stores and the MXU N dimension are lane-dense; the fc1 K dim keeps its
    true size.  Zero-padding is semantics-preserving: padded hidden units get
    zero weights and zero bias (ReLU(0)=0), padded output columns are sliced
    off after the kernel.
    Returns (padded_param_tuple, out_dim).
    """
    w1, b1, w2, b2, w3, b3 = params
    in_dim, hid = w1.shape
    out_dim = w3.shape[1]
    hid_p = _round_up(hid, 128)
    out_p = _round_up(out_dim, 128)

    def pad2(a, rows, cols):
        return jnp.pad(a, ((0, rows - a.shape[0]), (0, cols - a.shape[1])))

    w1p = pad2(w1, in_dim, hid_p).astype(jnp.bfloat16)
    w2p = pad2(w2, hid_p, hid_p).astype(jnp.bfloat16)
    w3p = pad2(w3, hid_p, out_p).astype(jnp.bfloat16)
    b1p = pad2(b1, 1, hid_p).astype(jnp.float32)
    b2p = pad2(b2, 1, hid_p).astype(jnp.float32)
    b3p = pad2(b3, 1, out_p).astype(jnp.float32)
    return (w1p, b1p, w2p, b2p, w3p, b3p), out_dim


@functools.partial(jax.jit, static_argnames=("tile_b", "out_dim", "out_dtype"))
def _forward_jit(x, padded_params, *, tile_b, out_dim, out_dtype):
    w1p, b1p, w2p, b2p, w3p, b3p = padded_params
    B, in_dim = x.shape
    hid_p = w1p.shape[1]
    out_p = w3p.shape[1]
    B_p = _round_up(B, tile_b)
    grid = (B_p // tile_b,)

    # bf16 cast BEFORE padding; only the batch (sublane) dim is padded.  The
    # feature dim stays at its true size (a block last dim equal to the full
    # array dim is legal).  Padded batch rows are sliced off below.
    xp = jnp.pad(x.astype(jnp.bfloat16), ((0, B_p - B), (0, 0)))

    in_specs = [
        pl.BlockSpec((tile_b, in_dim), lambda i: (i, 0)),   # x (batch-tiled)
        pl.BlockSpec((in_dim, hid_p), lambda i: (0, 0)),    # w1 (VMEM-resident)
        pl.BlockSpec((1, hid_p), lambda i: (0, 0)),         # b1
        pl.BlockSpec((hid_p, hid_p), lambda i: (0, 0)),     # w2
        pl.BlockSpec((1, hid_p), lambda i: (0, 0)),         # b2
        pl.BlockSpec((hid_p, out_p), lambda i: (0, 0)),     # w3
        pl.BlockSpec((1, out_p), lambda i: (0, 0)),         # b3
    ]
    out_spec = pl.BlockSpec((tile_b, out_p), lambda i: (i, 0))

    out_padded = pl.pallas_call(
        mlp_kernel,
        out_shape=jax.ShapeDtypeStruct((B_p, out_p), out_dtype),
        grid=grid,
        in_specs=in_specs,
        out_specs=out_spec,
        compiler_params=pltpu.CompilerParams(
            # Batch axis is embarrassingly parallel -> megacore sharding when
            # grid >= 2 (v7x).  Default scoped-VMEM budget is ample at these
            # sizes; set vmem_limit_bytes only if hidden/vocab grow.
            dimension_semantics=("parallel",),
        ),
    )(xp, w1p, b1p, w2p, b2p, w3p, b3p)

    return out_padded[:B, :out_dim]


def chatbot_forward(x, prepared, *, tile_b=None, out_dtype=jnp.float32):
    """Fused MLP forward.

    x: (B, input_size) float32 (any B >= 1; batch is padded internally).
    prepared: output of prepare_params(params).
    out_dtype: jnp.float32 (default, exact) or jnp.bfloat16 (halved writeback,
      fine if downstream only does argmax/softmax over the logits).
    """
    padded_params, out_dim = prepared
    B = x.shape[0]
    if tile_b is None:
        # One grid step per TensorCore: grid=(1,) on v5e/v6e, (2,) on v7x.
        tile_b = pl.cdiv(B, _num_tensorcores())
    tile_b = max(8, _round_up(min(tile_b, B), 8))  # sublane-aligned, <= batch
    tile_b = min(tile_b, 1024)                     # VMEM headroom cap
    # NOTE: (B, tile_b) are static under jit -> one retrace per distinct batch
    # size; bucket batch sizes if they vary in production.
    return _forward_jit(x, padded_params, tile_b=tile_b, out_dim=out_dim,
                        out_dtype=out_dtype)


def init_params(key, input_size, hidden_size, output_size):
    """Deterministic init mimicking nn.Linear's U(-1/sqrt(fan_in), ...)."""
    ks = jax.random.split(key, 6)

    def linear(kw, kb, fan_in, fan_out):
        bound = 1.0 / jnp.sqrt(jnp.float32(fan_in))
        w = jax.random.uniform(kw, (fan_in, fan_out), jnp.float32, -bound, bound)
        b = jax.random.uniform(kb, (1, fan_out), jnp.float32, -bound, bound)
        return w, b

    w1, b1 = linear(ks[0], ks[1], input_size, hidden_size)
    w2, b2 = linear(ks[2], ks[3], hidden_size, hidden_size)
    w3, b3 = linear(ks[4], ks[5], hidden_size, output_size)
    return (w1, b1, w2, b2, w3, b3)


@jax.jit
def reference_forward(x, params):
    """Pure-JAX reference with the same bf16-operand / f32-accumulate math."""
    w1, b1, w2, b2, w3, b3 = params
    bf = jnp.bfloat16
    h = jnp.dot(x.astype(bf), w1.astype(bf), preferred_element_type=jnp.float32)
    h = jnp.maximum(h + b1, 0.0)
    h = jnp.dot(h.astype(bf), w2.astype(bf), preferred_element_type=jnp.float32)
    h = jnp.maximum(h + b2, 0.0)
    return jnp.dot(h.astype(bf), w3.astype(bf),
                   preferred_element_type=jnp.float32) + b3


if __name__ == "__main__":
    # Small shapes consistent with the module (bag-of-words MLP classifier):
    # hidden_size=512 as in the original; input/output are the vocab/intent
    # counts, deliberately NOT multiples of 128 to exercise the layout path.
    input_size = 96
    hidden_size = 512
    output_size = 24

    key = jax.random.PRNGKey(0)
    kx1, kx2, kp = jax.random.split(key, 3)
    params = init_params(kp, input_size, hidden_size, output_size)
    prepared = prepare_params(params)  # pad + bf16-cast weights ONCE

    # 1) Small / ragged batch (padded to 8 rows, grid=(1,)).
    x_small = jax.random.uniform(kx1, (4, input_size), jnp.float32)
    out_small = jax.block_until_ready(chatbot_forward(x_small, prepared))
    ref_small = reference_forward(x_small, params)
    assert out_small.shape == (4, output_size)
    assert jnp.allclose(out_small, ref_small, atol=2e-3, rtol=2e-3)

    # 2) Larger batch: grid=(1,) on v5e/v6e (full batch), grid=(2,) on v7x.
    x_large = jax.random.uniform(kx2, (512, input_size), jnp.float32)
    out_large = jax.block_until_ready(chatbot_forward(x_large, prepared))
    ref_large = reference_forward(x_large, params)
    assert out_large.shape == (512, output_size)
    assert jnp.allclose(out_large, ref_large, atol=2e-3, rtol=2e-3)

    # 3) Optional bf16-logits path (halved output writeback).
    out_bf16 = jax.block_until_ready(
        chatbot_forward(x_large, prepared, out_dtype=jnp.bfloat16))
    assert out_bf16.dtype == jnp.bfloat16 and out_bf16.shape == (512, output_size)
    assert jnp.allclose(out_bf16.astype(jnp.float32), ref_large,
                        atol=3e-2, rtol=3e-2)

    print("KERNEL_OK")
</pallas_src>

<mosaic_0001>
module attributes {stable_mosaic.version = 11 : i64} {
  func.func @mlp_kernel(%arg0: i32, %arg1: memref<8x96xbf16, #tpu.memory_space<vmem>>, %arg2: memref<96x512xbf16, #tpu.memory_space<vmem>>, %arg3: memref<1x512xf32, #tpu.memory_space<vmem>>, %arg4: memref<512x512xbf16, #tpu.memory_space<vmem>>, %arg5: memref<1x512xf32, #tpu.memory_space<vmem>>, %arg6: memref<512x128xbf16, #tpu.memory_space<vmem>>, %arg7: memref<1x128xf32, #tpu.memory_space<vmem>>, %arg8: memref<8x128xf32, #tpu.memory_space<vmem>>) attributes {dimension_semantics = [#tpu.dimension_semantics<parallel>], iteration_bounds = array<i64: 1>, scalar_prefetch = 0 : i64, scratch_operands = 0 : i64, tpu.core_type = #tpu.core_type<tc>, window_params = [{transform_indices = @transform_0, window_bounds = array<i64: 8, 96>}, {pipeline_mode = #tpu.pipeline_mode<synchronous>, transform_indices = @transform_1, window_bounds = array<i64: 96, 512>}, {pipeline_mode = #tpu.pipeline_mode<synchronous>, transform_indices = @transform_2, window_bounds = array<i64: 1, 512>}, {pipeline_mode = #tpu.pipeline_mode<synchronous>, transform_indices = @transform_3, window_bounds = array<i64: 512, 512>}, {pipeline_mode = #tpu.pipeline_mode<synchronous>, transform_indices = @transform_4, window_bounds = array<i64: 1, 512>}, {pipeline_mode = #tpu.pipeline_mode<synchronous>, transform_indices = @transform_5, window_bounds = array<i64: 512, 128>}, {pipeline_mode = #tpu.pipeline_mode<synchronous>, transform_indices = @transform_6, window_bounds = array<i64: 1, 128>}, {transform_indices = @transform_7, window_bounds = array<i64: 8, 128>}]} {
    %c0 = arith.constant 0 : index
    %c0_0 = arith.constant 0 : index
    %0 = vector.load %arg1[%c0, %c0_0] : memref<8x96xbf16, #tpu.memory_space<vmem>>, vector<8x96xbf16>
    %c0_1 = arith.constant 0 : index
    %c0_2 = arith.constant 0 : index
    %1 = vector.load %arg2[%c0_1, %c0_2] : memref<96x512xbf16, #tpu.memory_space<vmem>>, vector<96x512xbf16>
    %cst = arith.constant dense<0.000000e+00> : vector<8x512xf32>
    %2 = tpu.matmul %0, %1, %cst {dimension_numbers = #tpu.dot_dimension_numbers<[1], [0], [0], [1], [0, 0, 1, 1], [], []>} : vector<8x96xbf16>, vector<96x512xbf16>, vector<8x512xf32> -> vector<8x512xf32>
    %c0_3 = arith.constant 0 : index
    %c0_4 = arith.constant 0 : index
    %3 = vector.load %arg3[%c0_3, %c0_4] : memref<1x512xf32, #tpu.memory_space<vmem>>, vector<1x512xf32>
    %4 = vector.broadcast %3 : vector<1x512xf32> to vector<8x512xf32>
    %5 = arith.addf %2, %4 : vector<8x512xf32>
    %cst_5 = arith.constant 0.000000e+00 : f32
    %6 = vector.broadcast %cst_5 : f32 to vector<8x512xf32>
    %7 = arith.maximumf %5, %6 : vector<8x512xf32>
    %8 = arith.truncf %7 : vector<8x512xf32> to vector<8x512xbf16>
    %c0_6 = arith.constant 0 : index
    %c0_7 = arith.constant 0 : index
    %9 = vector.load %arg4[%c0_6, %c0_7] : memref<512x512xbf16, #tpu.memory_space<vmem>>, vector<512x512xbf16>
    %cst_8 = arith.constant dense<0.000000e+00> : vector<8x512xf32>
    %10 = tpu.matmul %8, %9, %cst_8 {dimension_numbers = #tpu.dot_dimension_numbers<[1], [0], [0], [1], [0, 0, 1, 1], [], []>} : vector<8x512xbf16>, vector<512x512xbf16>, vector<8x512xf32> -> vector<8x512xf32>
    %c0_9 = arith.constant 0 : index
    %c0_10 = arith.constant 0 : index
    %11 = vector.load %arg5[%c0_9, %c0_10] : memref<1x512xf32, #tpu.memory_space<vmem>>, vector<1x512xf32>
    %12 = vector.broadcast %11 : vector<1x512xf32> to vector<8x512xf32>
    %13 = arith.addf %10, %12 : vector<8x512xf32>
    %cst_11 = arith.constant 0.000000e+00 : f32
    %14 = vector.broadcast %cst_11 : f32 to vector<8x512xf32>
    %15 = arith.maximumf %13, %14 : vector<8x512xf32>
    %16 = arith.truncf %15 : vector<8x512xf32> to vector<8x512xbf16>
    %c0_12 = arith.constant 0 : index
    %c0_13 = arith.constant 0 : index
    %17 = vector.load %arg6[%c0_12, %c0_13] : memref<512x128xbf16, #tpu.memory_space<vmem>>, vector<512x128xbf16>
    %cst_14 = arith.constant dense<0.000000e+00> : vector<8x128xf32>
    %18 = tpu.matmul %16, %17, %cst_14 {dimension_numbers = #tpu.dot_dimension_numbers<[1], [0], [0], [1], [0, 0, 1, 1], [], []>} : vector<8x512xbf16>, vector<512x128xbf16>, vector<8x128xf32> -> vector<8x128xf32>
    %c0_15 = arith.constant 0 : index
    %c0_16 = arith.constant 0 : index
    %19 = vector.load %arg7[%c0_15, %c0_16] : memref<1x128xf32, #tpu.memory_space<vmem>>, vector<1x128xf32>
    %20 = vector.broadcast %19 : vector<1x128xf32> to vector<8x128xf32>
    %21 = arith.addf %18, %20 : vector<8x128xf32>
    %c0_17 = arith.constant 0 : index
    %c0_18 = arith.constant 0 : index
    %22 = vector.load %arg8[%c0_17, %c0_18] : memref<8x128xf32, #tpu.memory_space<vmem>>, vector<8x128xf32>
    tpu.vector_store %arg8[%c0_17, %c0_18], %21 {strides = array<i32>} : memref<8x128xf32, #tpu.memory_space<vmem>>, vector<8x128xf32>,
    return
  }
  func.func @transform_0(%arg0: i32) -> (i32, i32) {
    %c0_i32 = arith.constant 0 : i32
    %c0_i32_0 = arith.constant 0 : i32
    return %arg0, %c0_i32 : i32, i32
  }
  func.func @transform_1(%arg0: i32) -> (i32, i32) {
    %c0_i32 = arith.constant 0 : i32
    %c0_i32_0 = arith.constant 0 : i32
    %c0_i32_1 = arith.constant 0 : i32
    return %c0_i32, %c0_i32_0 : i32, i32
  }
  func.func @transform_2(%arg0: i32) -> (i32, i32) {
    %c0_i32 = arith.constant 0 : i32
    %c0_i32_0 = arith.constant 0 : i32
    %c0_i32_1 = arith.constant 0 : i32
    return %c0_i32, %c0_i32_0 : i32, i32
  }
  func.func @transform_3(%arg0: i32) -> (i32, i32) {
    %c0_i32 = arith.constant 0 : i32
    %c0_i32_0 = arith.constant 0 : i32
    %c0_i32_1 = arith.constant 0 : i32
    return %c0_i32, %c0_i32_0 : i32, i32
  }
  func.func @transform_4(%arg0: i32) -> (i32, i32) {
    %c0_i32 = arith.constant 0 : i32
    %c0_i32_0 = arith.constant 0 : i32
    %c0_i32_1 = arith.constant 0 : i32
    return %c0_i32, %c0_i32_0 : i32, i32
  }
  func.func @transform_5(%arg0: i32) -> (i32, i32) {
    %c0_i32 = arith.constant 0 : i32
    %c0_i32_0 = arith.constant 0 : i32
    %c0_i32_1 = arith.constant 0 : i32
    return %c0_i32, %c0_i32_0 : i32, i32
  }
  func.func @transform_6(%arg0: i32) -> (i32, i32) {
    %c0_i32 = arith.constant 0 : i32
    %c0_i32_0 = arith.constant 0 : i32
    %c0_i32_1 = arith.constant 0 : i32
    return %c0_i32, %c0_i32_0 : i32, i32
  }
  func.func @transform_7(%arg0: i32) -> (i32, i32) {
    %c0_i32 = arith.constant 0 : i32
    %c0_i32_0 = arith.constant 0 : i32
    return %arg0, %c0_i32 : i32, i32
  }
}

</mosaic_0001>

<bundles_post_ra>
// kernel: _forward_jit.1
= control target key start
LH: loop header
LB: loop body
LE: loop exit
PB: predicated region body
PF: predicated region fallthrough
CT: control target
= control target key end

     0   :  { %12 = vsyncpa [#allocation3], 0  ;;  %s2719_s0 = inlined_call_operand.vmem [shape: bf16[8,96], index: 0, kind: input, shape index: {}]   ;;  %s2720_s1 = inlined_call_operand.hbm [shape: bf16[96,512], index: 1, kind: input, shape index: {}]   ;;  %s2721_s2 = inlined_call_operand.vmem [shape: f32[1,512], index: 2, kind: input, shape index: {}]   ;;  %s2722_s3 = inlined_call_operand.hbm [shape: bf16[512,512], index: 3, kind: input, shape index: {}]   ;;  %s2723_s4 = inlined_call_operand.vmem [shape: f32[1,512], index: 4, kind: input, shape index: {}]   ;;  %s2724_s5 = inlined_call_operand.hbm [shape: bf16[512,128], index: 5, kind: input, shape index: {}]   ;;  %s2725_s6 = inlined_call_operand.vmem [shape: f32[1,128], index: 6, kind: input, shape index: {}]   ;;  %s2726_s7 = inlined_call_operand.vmem [shape: f32[8,128], index: 7, kind: output, shape index: {}]  }
   0x1   :  { %13 = vsyncpa [#allocation5], 0  ;;  %s35_s26 = sshll.u32 %s2722_s3, 4  ;;  %s2614_s27 = smov [#allocation4]   ;;  %s36_s26 = int_to_ptr.hbm [resolvable:$true] %s35_s26 }
   0x2   :  { %s37_s28 = sshll.u32 %s2614_s27, 4  ;;  %s20_s8 = sshll.u32 %s2720_s1, 4  ;;  %s38_s28 = int_to_ptr.vmem [resolvable:$true] %s37_s28  ;;  %s21_s8 = int_to_ptr.hbm [resolvable:$true] %s20_s8 }
   0x3   :  { %s2615_s9 = smov 256   ;;  %s2616_s10 = smov 16  }
   0x4   :  { %43 = dma.hbm_to_vmem [thread:$0]  %s36_s26, 16384, %s38_s28, [#allocation5], %s2615_s9, %s2615_s9, %s2616_s10  }
   0x5   :  { %s2617_s11 = smov [#allocation2]   ;;  %s50_s15 = sshll.u32 %s2724_s5, 4  ;;  %s51_s15 = int_to_ptr.hbm [resolvable:$true] %s50_s15 }
   0x6   :  { %s22_s12 = sshll.u32 %s2617_s11, 4  ;;  %s2618_s3 = smov [#allocation6]   ;;  %s23_s12 = int_to_ptr.vmem [resolvable:$true] %s22_s12 }
   0x7   :  { %28 = dma.hbm_to_vmem [thread:$0]  %s21_s8, 3072, %s23_s12, [#allocation3], %s2615_s9, %s2615_s9, %s2616_s10  }
   0x8   :  { %s52_s16 = sshll.u32 %s2618_s3, 4  ;;  %s2619_s17 = smov 64   ;;  %s53_s16 = int_to_ptr.vmem [resolvable:$true] %s52_s16 }
   0x9   :  { %s2620_s18 = smov 4  }
   0xa   :  { %58 = dma.hbm_to_vmem [thread:$0]  %s51_s15, 4096, %s53_s16, [#allocation5], %s2619_s17, %s2619_s17, %s2620_s18  }
   0xb   :  { %2610 = dma.done.wait [#allocation3], 3072  }
   0xc   :  { %2611 = vsyncadd [#allocation3], 4294964224 }
   0xd   :  { %2612 = dma.done.wait [#allocation5], 20480  }
   0xe   :  { %2613 = vsyncadd [#allocation5], 4294946816  ;;  %v1688_v0 = vld [vmem:[#allocation2 + $0xa0] sm:$0xf]  ;;  %v2368_v1 = vld [vmem:[#allocation2 + $0xac] sm:$0xf0] }
   0xf   :  { %v2366_v2 = vld [vmem:[#allocation2 + $0xa4] sm:$0xf]  ;;  %v1689_v3 = vor.u32 %v2368_v1, %v1688_v0  ;;  %v1690_v4 = vld [vmem:[#allocation2 + $0xb0] sm:$0xf0]  ;;  %v1696_v5 = vld [vmem:[#allocation2 + $0xa8] sm:$0xf] }
  0x10   :  { %v2369_v6 = vld [vmem:[#allocation2 + $0xb4] sm:$0xf0]  ;;  %v1693_v7 = vor.u32 %v2366_v2, %v1690_v4  ;;  %v2367_v9 = vld [vmem:[#allocation2 + $0xac] sm:$0xf]  ;;  %v1698_v10 = vld [vmem:[#allocation2 + $0xb8] sm:$0xf0] }
  0x11   :  { %v1697_v8 = vor.u32 %v2369_v6, %v1696_v5  ;;  %v1672_v11 = vld [vmem:[#allocation2 + $0x80] sm:$0xf]  ;;  %235 = vmatpush.bf16.msra.mxu0 %v1689_v3  ;;  %v1701_v12 = vor.u32 %v2367_v9, %v1698_v10  ;;  %v2364_v13 = vld [vmem:[#allocation2 + $0x8c] sm:$0xf0]  ;;  %v2362_v14 = vld [vmem:[#allocation2 + $0x84] sm:$0xf] }
  0x12   :  { %v1674_v15 = vld [vmem:[#allocation2 + $0x90] sm:$0xf0]  ;;  %248 = vmatpush.bf16.msra.mxu1 %v1693_v7  ;;  %v1673_v16 = vor.u32 %v2364_v13, %v1672_v11  ;;  %v1680_v18 = vld [vmem:[#allocation2 + $0x88] sm:$0xf]  ;;  %v2365_v19 = vld [vmem:[#allocation2 + $0x94] sm:$0xf0] }
  0x13   :  { %261 = vmatpush.bf16.msra.mxu2 %v1697_v8  ;;  %v1677_v17 = vor.u32 %v2362_v14, %v1674_v15  ;;  %v2363_v20 = vld [vmem:[#allocation2 + $0x8c] sm:$0xf]  ;;  %274 = vmatpush.bf16.msra.mxu3 %v1701_v12  ;;  %v1681_v21 = vor.u32 %v2365_v19, %v1680_v18  ;;  %v1682_v22 = vld [vmem:[#allocation2 + $0x98] sm:$0xf0]  ;;  %v1656_v23 = vld [vmem:[#allocation2 + $0x60] sm:$0xf] }
  0x14   :  { %v2360_v24 = vld [vmem:[#allocation2 + $0x6c] sm:$0xf0]  ;;  %v1685_v25 = vor.u32 %v2363_v20, %v1682_v22  ;;  %v2358_v26 = vld [vmem:[#allocation2 + $0x64] sm:$0xf]  ;;  %v1658_v27 = vld [vmem:[#allocation2 + $0x70] sm:$0xf0] }
  0x15   :  { %v1664_v28 = vld [vmem:[#allocation2 + $0x68] sm:$0xf]  ;;  %236 = vmatpush.bf16.msra.mxu0 %v1673_v16  ;;  %v1657_v29 = vor.u32 %v2360_v24, %v1656_v23  ;;  %v2361_v30 = vld [vmem:[#allocation2 + $0x74] sm:$0xf0]  ;;  %v2359_v31 = vld [vmem:[#allocation2 + $0x6c] sm:$0xf]  ;;  %v1661_v33 = vor.u32 %v2358_v26, %v1658_v27 }
  0x16   :  { %v1666_v32 = vld [vmem:[#allocation2 + $0x78] sm:$0xf0]  ;;  %249 = vmatpush.bf16.msra.mxu1 %v1677_v17  ;;  %v1665_v34 = vor.u32 %v2361_v30, %v1664_v28  ;;  %v1640_v35 = vld [vmem:[#allocation2 + $0x40] sm:$0xf]  ;;  %v2356_v36 = vld [vmem:[#allocation2 + $0x4c] sm:$0xf0] }
  0x17   :  { %262 = vmatpush.bf16.msra.mxu2 %v1681_v21  ;;  %v2354_v37 = vld [vmem:[#allocation2 + $0x44] sm:$0xf]  ;;  %275 = vmatpush.bf16.msra.mxu3 %v1685_v25  ;;  %v1669_v38 = vor.u32 %v2359_v31, %v1666_v32  ;;  %v1642_v39 = vld [vmem:[#allocation2 + $0x50] sm:$0xf0]  ;;  %v1648_v40 = vld [vmem:[#allocation2 + $0x48] sm:$0xf]  ;;  %v1641_v44 = vor.u32 %v2356_v36, %v1640_v35 }
  0x18   :  { %v2357_v41 = vld [vmem:[#allocation2 + $0x54] sm:$0xf0]  ;;  %v2355_v42 = vld [vmem:[#allocation2 + $0x4c] sm:$0xf]  ;;  %v1650_v43 = vld [vmem:[#allocation2 + $0x58] sm:$0xf0]  ;;  %v1645_v45 = vor.u32 %v2354_v37, %v1642_v39 }
  0x19   :  { %237 = vmatpush.bf16.msra.mxu0 %v1657_v29  ;;  %v1649_v46 = vor.u32 %v2357_v41, %v1648_v40  ;;  %v1624_v47 = vld [vmem:[#allocation2 + $0x20] sm:$0xf]  ;;  %v2352_v48 = vld [vmem:[#allocation2 + $0x2c] sm:$0xf0]  ;;  %v2350_v49 = vld [vmem:[#allocation2 + $0x24] sm:$0xf]  ;;  %v1653_v50 = vor.u32 %v2355_v42, %v1650_v43 }
  0x1a   :  { %250 = vmatpush.bf16.msra.mxu1 %v1661_v33  ;;  %v1626_v51 = vld [vmem:[#allocation2 + $0x30] sm:$0xf0]  ;;  %v1632_v52 = vld [vmem:[#allocation2 + $0x28] sm:$0xf]  ;;  %v2353_v53 = vld [vmem:[#allocation2 + $0x34] sm:$0xf0]  ;;  %v1625_v56 = vor.u32 %v2352_v48, %v1624_v47 }
  0x1b   :  { %263 = vmatpush.bf16.msra.mxu2 %v1665_v34  ;;  %276 = vmatpush.bf16.msra.mxu3 %v1669_v38  ;;  %v2351_v54 = vld [vmem:[#allocation2 + $0x2c] sm:$0xf]  ;;  %v1634_v55 = vld [vmem:[#allocation2 + $0x38] sm:$0xf0]  ;;  %v1608_v57 = vld [vmem:[#allocation2] sm:$0xf]  ;;  %v1629_v58 = vor.u32 %v2350_v49, %v1626_v51  ;;  %v1633_v59 = vor.u32 %v2353_v53, %v1632_v52 }
  0x1c   :  { %v2348_v60 = vld [vmem:[#allocation2 + $0xc] sm:$0xf0]  ;;  %v2346_v61 = vld [vmem:[#allocation2 + $0x4] sm:$0xf]  ;;  %v1610_v62 = vld [vmem:[#allocation2 + $0x10] sm:$0xf0]  ;;  %v1637_v63 = vor.u32 %v2351_v54, %v1634_v55 }
  0x1d   :  { %238 = vmatpush.bf16.msra.mxu0 %v1641_v44  ;;  %v1616_v0 = vld [vmem:[#allocation2 + $0x8] sm:$0xf]  ;;  %v2349_v1 = vld [vmem:[#allocation2 + $0x14] sm:$0xf0]  ;;  %v2347_v2 = vld [vmem:[#allocation2 + $0xc] sm:$0xf]  ;;  %v1609_v6 = vor.u32 %v2348_v60, %v1608_v57  ;;  %v1613_v9 = vor.u32 %v2346_v61, %v1610_v62 }
  0x1e   :  { %251 = vmatpush.bf16.msra.mxu1 %v1645_v45  ;;  %v1618_v3 = vld [vmem:[#allocation2 + $0x18] sm:$0xf0]  ;;  %v1820_v4 = vld [vmem:[#allocation4 + $0xe0] sm:$0xf]  ;;  %v2400_v5 = vld [vmem:[#allocation4 + $0xec] sm:$0xf0]  ;;  %v1617_v10 = vor.u32 %v2349_v1, %v1616_v0 }
  0x1f   :  { %264 = vmatpush.bf16.msra.mxu2 %v1649_v46  ;;  %277 = vmatpush.bf16.msra.mxu3 %v1653_v50  ;;  %v1948_v7 = vld [vmem:[#allocation4 + $0x1e0] sm:$0xf]  ;;  %v2432_v8 = vld [vmem:[#allocation4 + $0x1ec] sm:$0xf0]  ;;  %vm229_vm0 = vcmask 785408   ;;  %v1621_v11 = vor.u32 %v2347_v2, %v1618_v3  ;;  %v1821_v12 = vor.u32 %v2400_v5, %v1820_v4 }
  0x20   :  { %v1804_v13 = vld [vmem:[#allocation4 + $0xc0] sm:$0xf]  ;;  %v2464_v15 = vld [vmem:[#allocation4 + $0x2ec] sm:$0xf0]  ;;  %v1949_v16 = vor.u32 %v2432_v8, %v1948_v7 }
  0x21   :  { %239 = vmatpush.bf16.msra.mxu0 %v1625_v56  ;;  %v2076_v14 = vld [vmem:[#allocation4 + $0x2e0] sm:$0xf]  ;;  %v2396_v17 = vld [vmem:[#allocation4 + $0xcc] sm:$0xf0] }
  0x22   :  { %252 = vmatpush.bf16.msra.mxu1 %v1629_v58  ;;  %v2204_v18 = vld [vmem:[#allocation4 + $0x3e0] sm:$0xf]  ;;  %v2496_v19 = vld [vmem:[#allocation4 + $0x3ec] sm:$0xf0]  ;;  %v2077_v23 = vor.u32 %v2464_v15, %v2076_v14  ;;  %v1805_v24 = vor.u32 %v2396_v17, %v1804_v13 }
  0x23   :  { %265 = vmatpush.bf16.msra.mxu2 %v1633_v59  ;;  %278 = vmatpush.bf16.msra.mxu3 %v1637_v63  ;;  %v74_v20 = vld [vmem:[%s2719_s0] sm:$0xf]  ;;  %v2428_v22 = vld [vmem:[#allocation4 + $0x1cc] sm:$0xf0]  ;;  %v2205_v25 = vor.u32 %v2496_v19, %v2204_v18 }
  0x24   :  { %v1932_v21 = vld [vmem:[#allocation4 + $0x1c0] sm:$0xf]  ;;  %v2460_v28 = vld [vmem:[#allocation4 + $0x2cc] sm:$0xf0] }
  0x25   :  { %240 = vmatpush.bf16.msra.mxu0 %v1609_v6  ;;  %v1788_v26 = vld [vmem:[#allocation4 + $0xa0] sm:$0xf]  ;;  %v1933_v29 = vor.u32 %v2428_v22, %v1932_v21  ;;  %v2392_v30 = vld [vmem:[#allocation4 + $0xac] sm:$0xf0] }
  0x26   :  { %253 = vmatpush.bf16.msra.mxu1 %v1613_v9  ;;  %v2060_v27 = vld [vmem:[#allocation4 + $0x2c0] sm:$0xf]  ;;  %v2492_v32 = vld [vmem:[#allocation4 + $0x3cc] sm:$0xf0]  ;;  %v1789_v36 = vor.u32 %v2392_v30, %v1788_v26 }
  0x27   :  { %266 = vmatpush.bf16.msra.mxu2 %v1617_v10  ;;  %279 = vmatpush.bf16.msra.mxu3 %v1621_v11  ;;  %v2188_v31 = vld [vmem:[#allocation4 + $0x3c0] sm:$0xf]  ;;  %v2424_v34 = vld [vmem:[#allocation4 + $0x1ac] sm:$0xf0]  ;;  %v2061_v35 = vor.u32 %v2460_v28, %v2060_v27 }
  0x28   :  { %1702 = vmatmul.msk.bf16.vlgmr.msra.gmra.mxu0 %vm229_vm0, %v74_v20  ;;  %v1916_v33 = vld [vmem:[#allocation4 + $0x1a0] sm:$0xf]  ;;  %v2189_v37 = vor.u32 %v2492_v32, %v2188_v31  ;;  %v2456_v40 = vld [vmem:[#allocation4 + $0x2ac] sm:$0xf0]  ;;  %v2398_v31 = vld [vmem:[#allocation4 + $0xe4] sm:$0xf] }
  0x29   :  { %1071 = vmatpush.bf16.msrb.mxu0 %v1821_v12  ;;  %1703 = vmatmul.msk.bf16.vlgmr.msra.gmra.mxu1 %vm229_vm0, %v74_v20  ;;  %v1772_v38 = vld [vmem:[#allocation4 + $0x80] sm:$0xf]  ;;  %v1917_v41 = vor.u32 %v2424_v34, %v1916_v33  ;;  %v2388_v42 = vld [vmem:[#allocation4 + $0x8c] sm:$0xf0]  ;;  %v1822_v32 = vld [vmem:[#allocation4 + $0xf0] sm:$0xf0] }
  0x2a   :  { %1084 = vmatpush.bf16.msrb.mxu1 %v1949_v16  ;;  %1704 = vmatmul.msk.bf16.vlgmr.msra.gmra.mxu2 %vm229_vm0, %v74_v20  ;;  %v2044_v39 = vld [vmem:[#allocation4 + $0x2a0] sm:$0xf]  ;;  %v2488_v44 = vld [vmem:[#allocation4 + $0x3ac] sm:$0xf0]  ;;  %v1773_v48 = vor.u32 %v2388_v42, %v1772_v38  ;;  %v2430_v33 = vld [vmem:[#allocation4 + $0x1e4] sm:$0xf] }
  0x2b   :  { %1705 = vmatmul.msk.bf16.vlgmr.msra.gmra.mxu3 %vm229_vm0, %v74_v20  ;;  %1097 = vmatpush.bf16.msrb.mxu2 %v2077_v23  ;;  %v2172_v43 = vld [vmem:[#allocation4 + $0x3a0] sm:$0xf]  ;;  %v2420_v46 = vld [vmem:[#allocation4 + $0x18c] sm:$0xf0]  ;;  %v2045_v47 = vor.u32 %v2456_v40, %v2044_v39  ;;  %v1950_v34 = vld [vmem:[#allocation4 + $0x1f0] sm:$0xf0] }
  0x2c   :  { %1110 = vmatpush.bf16.msrb.mxu3 %v2205_v25  ;;  %v1900_v45 = vld [vmem:[#allocation4 + $0x180] sm:$0xf]  ;;  %v2173_v49 = vor.u32 %v2488_v44, %v2172_v43  ;;  %v2452_v52 = vld [vmem:[#allocation4 + $0x28c] sm:$0xf0]  ;;  %v2394_v38 = vld [vmem:[#allocation4 + $0xc4] sm:$0xf]  ;;  %v1825_v44 = vor.u32 %v2398_v31, %v1822_v32 }
  0x2d   :  { %1072 = vmatpush.bf16.msrb.mxu0 %v1805_v24  ;;  %v1756_v50 = vld [vmem:[#allocation4 + $0x60] sm:$0xf]  ;;  %v1901_v53 = vor.u32 %v2420_v46, %v1900_v45  ;;  %v2384_v54 = vld [vmem:[#allocation4 + $0x6c] sm:$0xf0]  ;;  %v1806_v39 = vld [vmem:[#allocation4 + $0xd0] sm:$0xf0] }
  0x2e   :  { %1085 = vmatpush.bf16.msrb.mxu1 %v1933_v29  ;;  %v2028_v51 = vld [vmem:[#allocation4 + $0x280] sm:$0xf]  ;;  %v2484_v56 = vld [vmem:[#allocation4 + $0x38c] sm:$0xf0]  ;;  %v1757_v60 = vor.u32 %v2384_v54, %v1756_v50  ;;  %v2462_v46 = vld [vmem:[#allocation4 + $0x2e4] sm:$0xf] }
  0x2f   :  { %1098 = vmatpush.bf16.msrb.mxu2 %v2061_v35  ;;  %v2156_v55 = vld [vmem:[#allocation4 + $0x380] sm:$0xf]  ;;  %v2416_v58 = vld [vmem:[#allocation4 + $0x16c] sm:$0xf0]  ;;  %v2029_v59 = vor.u32 %v2452_v52, %v2028_v51  ;;  %v2206_v50 = vld [vmem:[#allocation4 + $0x3f0] sm:$0xf0] }
  0x30   :  { %1111 = vmatpush.bf16.msrb.mxu3 %v2189_v37  ;;  %v1884_v57 = vld [vmem:[#allocation4 + $0x160] sm:$0xf]  ;;  %v2157_v61 = vor.u32 %v2484_v56, %v2156_v55  ;;  %v2448_v0 = vld [vmem:[#allocation4 + $0x26c] sm:$0xf0]  ;;  %v2426_v51 = vld [vmem:[#allocation4 + $0x1c4] sm:$0xf]  ;;  %v1809_v56 = vor.u32 %v2394_v38, %v1806_v39 }
  0x31   :  { %1073 = vmatpush.bf16.msrb.mxu0 %v1789_v36  ;;  %v1740_v62 = vld [vmem:[#allocation4 + $0x40] sm:$0xf]  ;;  %v1885_v1 = vor.u32 %v2416_v58, %v1884_v57  ;;  %v2380_v2 = vld [vmem:[#allocation4 + $0x4c] sm:$0xf0]  ;;  %v1934_v52 = vld [vmem:[#allocation4 + $0x1d0] sm:$0xf0] }
  0x32   :  { %1086 = vmatpush.bf16.msrb.mxu1 %v1917_v41  ;;  %v2012_v63 = vld [vmem:[#allocation4 + $0x260] sm:$0xf]  ;;  %v2480_v4 = vld [vmem:[#allocation4 + $0x36c] sm:$0xf0]  ;;  %v1741_v8 = vor.u32 %v2380_v2, %v1740_v62  ;;  %v2390_v58 = vld [vmem:[#allocation4 + $0xa4] sm:$0xf] }
  0x33   :  { %1099 = vmatpush.bf16.msrb.mxu2 %v2045_v47  ;;  %v2140_v3 = vld [vmem:[#allocation4 + $0x360] sm:$0xf]  ;;  %v2412_v6 = vld [vmem:[#allocation4 + $0x14c] sm:$0xf0]  ;;  %v2013_v7 = vor.u32 %v2448_v0, %v2012_v63  ;;  %v2078_v47 = vld [vmem:[#allocation4 + $0x2f0] sm:$0xf0] }
  0x34   :  { %1112 = vmatpush.bf16.msrb.mxu3 %v2173_v49  ;;  %v1868_v5 = vld [vmem:[#allocation4 + $0x140] sm:$0xf]  ;;  %v2141_v9 = vor.u32 %v2480_v4, %v2140_v3  ;;  %v2444_v12 = vld [vmem:[#allocation4 + $0x24c] sm:$0xf0]  ;;  %v2494_v49 = vld [vmem:[#allocation4 + $0x3e4] sm:$0xf]  ;;  %v2081_v55 = vor.u32 %v2462_v46, %v2078_v47 }
  0x35   :  { %1074 = vmatpush.bf16.msrb.mxu0 %v1773_v48  ;;  %v1724_v10 = vld [vmem:[#allocation4 + $0x20] sm:$0xf]  ;;  %v1869_v13 = vor.u32 %v2412_v6, %v1868_v5  ;;  %v2376_v14 = vld [vmem:[#allocation4 + $0x2c] sm:$0xf0]  ;;  %v1953_v48 = vor.u32 %v2430_v33, %v1950_v34  ;;  %v2209_v57 = vor.u32 %v2494_v49, %v2206_v50  ;;  %v1790_v62 = vld [vmem:[#allocation4 + $0xb0] sm:$0xf0] }
  0x36   :  { %1087 = vmatpush.bf16.msrb.mxu1 %v1901_v53  ;;  %v1996_v11 = vld [vmem:[#allocation4 + $0x240] sm:$0xf]  ;;  %v2476_v16 = vld [vmem:[#allocation4 + $0x34c] sm:$0xf0]  ;;  %v1725_v21 = vor.u32 %v2376_v14, %v1724_v10  ;;  %v2490_v63 = vld [vmem:[#allocation4 + $0x3c4] sm:$0xf]  ;;  %v1793_v4 = vor.u32 %v2390_v58, %v1790_v62 }
  0x37   :  { %1100 = vmatpush.bf16.msrb.mxu2 %v2029_v59  ;;  %v2124_v15 = vld [vmem:[#allocation4 + $0x340] sm:$0xf]  ;;  %v2408_v18 = vld [vmem:[#allocation4 + $0x12c] sm:$0xf0]  ;;  %v1997_v19 = vor.u32 %v2444_v12, %v1996_v11  ;;  %v2458_v59 = vld [vmem:[#allocation4 + $0x2c4] sm:$0xf] }
  0x38   :  { %1113 = vmatpush.bf16.msrb.mxu3 %v2157_v61  ;;  %v1852_v17 = vld [vmem:[#allocation4 + $0x120] sm:$0xf]  ;;  %v2125_v22 = vor.u32 %v2476_v16, %v2124_v15  ;;  %v2372_v23 = vld [vmem:[#allocation4 + $0xc] sm:$0xf0]  ;;  %v1937_v61 = vor.u32 %v2426_v51, %v1934_v52  ;;  %v2190_v0 = vld [vmem:[#allocation4 + $0x3d0] sm:$0xf0] }
  0x39   :  { %1075 = vmatpush.bf16.msrb.mxu0 %v1757_v60  ;;  %v1708_v20 = vld [vmem:[#allocation4] sm:$0xf]  ;;  %v2440_v25 = vld [vmem:[#allocation4 + $0x22c] sm:$0xf0]  ;;  %v1853_v26 = vor.u32 %v2408_v18, %v1852_v17  ;;  %v2062_v60 = vld [vmem:[#allocation4 + $0x2d0] sm:$0xf0]  ;;  %v2193_v5 = vor.u32 %v2490_v63, %v2190_v0 }
  0x3a   :  { %1088 = vmatpush.bf16.msrb.mxu1 %v1885_v1  ;;  %v1980_v24 = vld [vmem:[#allocation4 + $0x220] sm:$0xf]  ;;  %v2472_v29 = vld [vmem:[#allocation4 + $0x32c] sm:$0xf0]  ;;  %v1709_v36 = vor.u32 %v2372_v23, %v1708_v20  ;;  %v2422_v1 = vld [vmem:[#allocation4 + $0x1a4] sm:$0xf]  ;;  %v2065_v3 = vor.u32 %v2458_v59, %v2062_v60 }
  0x3b   :  { %1101 = vmatpush.bf16.msrb.mxu2 %v2013_v7  ;;  %v1836_v27 = vld [vmem:[#allocation4 + $0x100] sm:$0xf]  ;;  %v2404_v30 = vld [vmem:[#allocation4 + $0x10c] sm:$0xf0]  ;;  %v1981_v35 = vor.u32 %v2440_v25, %v1980_v24  ;;  %v1918_v2 = vld [vmem:[#allocation4 + $0x1b0] sm:$0xf0] }
  0x3c   :  { %1114 = vmatpush.bf16.msrb.mxu3 %v2141_v9  ;;  %v2108_v28 = vld [vmem:[#allocation4 + $0x320] sm:$0xf]  ;;  %v2436_v41 = vld [vmem:[#allocation4 + $0x20c] sm:$0xf0]  ;;  %v1837_v43 = vor.u32 %v2404_v30, %v1836_v27  ;;  %v2386_v6 = vld [vmem:[#allocation4 + $0x84] sm:$0xf]  ;;  %v1921_v9 = vor.u32 %v2422_v1, %v1918_v2 }
  0x3d   :  { %1076 = vmatpush.bf16.msrb.mxu0 %v1741_v8  ;;  %v2109_v37 = vor.u32 %v2472_v29, %v2108_v28  ;;  %v1964_v40 = vld [vmem:[#allocation4 + $0x200] sm:$0xf]  ;;  %v2468_v45 = vld [vmem:[#allocation4 + $0x30c] sm:$0xf0]  ;;  %v2454_v7 = vld [vmem:[#allocation4 + $0x2a4] sm:$0xf] }
  0x3e   :  { %1089 = vmatpush.bf16.msrb.mxu1 %v1869_v13  ;;  %v2092_v42 = vld [vmem:[#allocation4 + $0x300] sm:$0xf]  ;;  %v1965_v53 = vor.u32 %v2436_v41, %v1964_v40  ;;  %v2046_v8 = vld [vmem:[#allocation4 + $0x2b0] sm:$0xf0]  ;;  %v2486_v11 = vld [vmem:[#allocation4 + $0x3a4] sm:$0xf] }
  0x3f   :  { %1102 = vmatpush.bf16.msrb.mxu2 %v1997_v19  ;;  %v2093_v54 = vor.u32 %v2468_v45, %v2092_v42  ;;  %v1774_v10 = vld [vmem:[#allocation4 + $0x90] sm:$0xf0]  ;;  %v2418_v13 = vld [vmem:[#allocation4 + $0x184] sm:$0xf]  ;;  %v2049_v15 = vor.u32 %v2454_v7, %v2046_v8 }
  0x40   :  { %1115 = vmatpush.bf16.msrb.mxu3 %v2125_v22  ;;  %v2174_v12 = vld [vmem:[#allocation4 + $0x3b0] sm:$0xf0]  ;;  %v1777_v16 = vor.u32 %v2386_v6, %v1774_v10  ;;  %v2382_v18 = vld [vmem:[#allocation4 + $0x64] sm:$0xf] }
  0x41   :  { %1077 = vmatpush.bf16.msrb.mxu0 %v1725_v21  ;;  %v1902_v14 = vld [vmem:[#allocation4 + $0x190] sm:$0xf0]  ;;  %v2177_v17 = vor.u32 %v2486_v11, %v2174_v12  ;;  %v2450_v19 = vld [vmem:[#allocation4 + $0x284] sm:$0xf] }
  0x42   :  { %1090 = vmatpush.bf16.msrb.mxu1 %v1853_v26  ;;  %v2030_v20 = vld [vmem:[#allocation4 + $0x290] sm:$0xf0]  ;;  %v1905_v21 = vor.u32 %v2418_v13, %v1902_v14  ;;  %v2482_v23 = vld [vmem:[#allocation4 + $0x384] sm:$0xf] }
  0x43   :  { %1103 = vmatpush.bf16.msrb.mxu2 %v1981_v35  ;;  %v1758_v22 = vld [vmem:[#allocation4 + $0x70] sm:$0xf0]  ;;  %v2414_v25 = vld [vmem:[#allocation4 + $0x164] sm:$0xf]  ;;  %v2033_v27 = vor.u32 %v2450_v19, %v2030_v20  ;;  %v2433_v19 = vld [vmem:[#allocation4 + $0x1f4] sm:$0xf0] }
  0x44   :  { %1116 = vmatpush.bf16.msrb.mxu3 %v2109_v37  ;;  %v2158_v24 = vld [vmem:[#allocation4 + $0x390] sm:$0xf0]  ;;  %v1761_v28 = vor.u32 %v2382_v18, %v1758_v22  ;;  %v2378_v31 = vld [vmem:[#allocation4 + $0x44] sm:$0xf]  ;;  %v1956_v18 = vld [vmem:[#allocation4 + $0x1e8] sm:$0xf] }
  0x45   :  { %1078 = vmatpush.bf16.msrb.mxu0 %v1709_v36  ;;  %v1886_v26 = vld [vmem:[#allocation4 + $0x170] sm:$0xf0]  ;;  %v2161_v29 = vor.u32 %v2482_v23, %v2158_v24  ;;  %v2410_v33 = vld [vmem:[#allocation4 + $0x144] sm:$0xf] }
  0x46   :  { %1091 = vmatpush.bf16.msrb.mxu1 %v1837_v43  ;;  %v1889_v30 = vor.u32 %v2414_v25, %v1886_v26  ;;  %v1742_v32 = vld [vmem:[#allocation4 + $0x50] sm:$0xf0]  ;;  %v2446_v37 = vld [vmem:[#allocation4 + $0x264] sm:$0xf]  ;;  %v1957_v26 = vor.u32 %v2433_v19, %v1956_v18 }
  0x47   :  { %1104 = vmatpush.bf16.msrb.mxu2 %v1965_v53  ;;  %v1870_v34 = vld [vmem:[#allocation4 + $0x150] sm:$0xf0]  ;;  %v1745_v35 = vor.u32 %v2378_v31, %v1742_v32  ;;  %v2478_v39 = vld [vmem:[#allocation4 + $0x364] sm:$0xf]  ;;  %v2429_v31 = vld [vmem:[#allocation4 + $0x1d4] sm:$0xf0] }
  0x48   :  { %1117 = vmatpush.bf16.msrb.mxu3 %v2093_v54  ;;  %v1873_v36 = vor.u32 %v2410_v33, %v1870_v34  ;;  %v2014_v38 = vld [vmem:[#allocation4 + $0x270] sm:$0xf0]  ;;  %v2374_v43 = vld [vmem:[#allocation4 + $0x24] sm:$0xf] }
  0x49   :  { %1123 = vmatpush.bf16.msra.mxu0 %v1825_v44  ;;  %v2017_v40 = vor.u32 %v2446_v37, %v2014_v38  ;;  %v2142_v41 = vld [vmem:[#allocation4 + $0x370] sm:$0xf0]  ;;  %v2406_v46 = vld [vmem:[#allocation4 + $0x124] sm:$0xf]  ;;  %v2084_v37 = vld [vmem:[#allocation4 + $0x2e8] sm:$0xf] }
  0x4a   :  { %1136 = vmatpush.bf16.msra.mxu1 %v1953_v48  ;;  %v2145_v42 = vor.u32 %v2478_v39, %v2142_v41  ;;  %v1726_v44 = vld [vmem:[#allocation4 + $0x30] sm:$0xf0]  ;;  %v2442_v49 = vld [vmem:[#allocation4 + $0x244] sm:$0xf]  ;;  %v2465_v38 = vld [vmem:[#allocation4 + $0x2f4] sm:$0xf0] }
  0x4b   :  { %1149 = vmatpush.bf16.msra.mxu2 %v2081_v55  ;;  %v1729_v45 = vor.u32 %v2374_v43, %v1726_v44  ;;  %v1854_v47 = vld [vmem:[#allocation4 + $0x130] sm:$0xf0]  ;;  %v2474_v51 = vld [vmem:[#allocation4 + $0x344] sm:$0xf]  ;;  %v2212_v39 = vld [vmem:[#allocation4 + $0x3e8] sm:$0xf] }
  0x4c   :  { %1162 = vmatpush.bf16.msra.mxu3 %v2209_v57  ;;  %v1857_v48 = vor.u32 %v2406_v46, %v1854_v47  ;;  %v1998_v50 = vld [vmem:[#allocation4 + $0x250] sm:$0xf0]  ;;  %v2370_v55 = vld [vmem:[#allocation4 + $0x4] sm:$0xf]  ;;  %v2497_v43 = vld [vmem:[#allocation4 + $0x3f4] sm:$0xf0] }
  0x4d   :  { %1124 = vmatpush.bf16.msra.mxu0 %v1809_v56  ;;  %v2001_v52 = vor.u32 %v2442_v49, %v1998_v50  ;;  %v2126_v53 = vld [vmem:[#allocation4 + $0x350] sm:$0xf0]  ;;  %v2402_v57 = vld [vmem:[#allocation4 + $0x104] sm:$0xf]  ;;  %v1796_v44 = vld [vmem:[#allocation4 + $0xa8] sm:$0xf]  ;;  %v2085_v50 = vor.u32 %v2465_v38, %v2084_v37 }
  0x4e   :  { %1137 = vmatpush.bf16.msra.mxu1 %v1937_v61  ;;  %v2129_v54 = vor.u32 %v2474_v51, %v2126_v53  ;;  %v1710_v56 = vld [vmem:[#allocation4 + $0x10] sm:$0xf0]  ;;  %v2438_v61 = vld [vmem:[#allocation4 + $0x224] sm:$0xf]  ;;  %v1924_v47 = vld [vmem:[#allocation4 + $0x1a8] sm:$0xf] }
  0x4f   :  { %1150 = vmatpush.bf16.msra.mxu2 %v2065_v3  ;;  %v1713_v58 = vor.u32 %v2370_v55, %v1710_v56  ;;  %v1838_v59 = vld [vmem:[#allocation4 + $0x110] sm:$0xf0]  ;;  %v2470_v0 = vld [vmem:[#allocation4 + $0x324] sm:$0xf]  ;;  %v2461_v55 = vld [vmem:[#allocation4 + $0x2d4] sm:$0xf0] }
  0x50   :  { %1163 = vmatpush.bf16.msra.mxu3 %v2193_v5  ;;  %v1841_v60 = vor.u32 %v2402_v57, %v1838_v59  ;;  %v1982_v62 = vld [vmem:[#allocation4 + $0x230] sm:$0xf0]  ;;  %v2434_v3 = vld [vmem:[#allocation4 + $0x204] sm:$0xf]  ;;  %v2196_v56 = vld [vmem:[#allocation4 + $0x3c8] sm:$0xf] }
  0x51   :  { %1125 = vmatpush.bf16.msra.mxu0 %v1793_v4  ;;  %v1985_v63 = vor.u32 %v2438_v61, %v1982_v62  ;;  %v2110_v1 = vld [vmem:[#allocation4 + $0x330] sm:$0xf0]  ;;  %v2466_v6 = vld [vmem:[#allocation4 + $0x304] sm:$0xf]  ;;  %v2493_v59 = vld [vmem:[#allocation4 + $0x3d4] sm:$0xf0] }
  0x52   :  { %1138 = vmatpush.bf16.msra.mxu1 %v1921_v9  ;;  %v2113_v2 = vor.u32 %v2470_v0, %v2110_v1  ;;  %v1966_v4 = vld [vmem:[#allocation4 + $0x210] sm:$0xf0]  ;;  %v99_v9 = vld [vmem:[%s2721_s2] sm:$0xf]  ;;  %v2389_v61 = vld [vmem:[#allocation4 + $0x94] sm:$0xf0] }
  0x53   :  { %1151 = vmatpush.bf16.msra.mxu2 %v2049_v15  ;;  %v1969_v5 = vor.u32 %v2434_v3, %v1966_v4  ;;  %v2094_v7 = vld [vmem:[#allocation4 + $0x310] sm:$0xf0]  ;;  %v101_v10 = vperm.slane %v99_v9, 0  ;;  %v102_v11 = vperm.slane %v99_v9, 1  ;;  %v1828_v15 = vld [vmem:[#allocation4 + $0xe8] sm:$0xf]  ;;  %v2197_v3 = vor.u32 %v2493_v59, %v2196_v56 }
  0x54   :  { %1164 = vmatpush.bf16.msra.mxu3 %v2177_v17  ;;  %v2097_v8 = vor.u32 %v2466_v6, %v2094_v7  ;;  %v103_v22 = vperm.slane %v99_v9, 2  ;;  %v104_v25 = vperm.slane %v99_v9, 3  ;;  %v1908_v62 = vld [vmem:[#allocation4 + $0x188] sm:$0xf]  ;;  %v2457_v6 = vld [vmem:[#allocation4 + $0x2b4] sm:$0xf0] }
  0x55   :  { %1126 = vmatpush.bf16.msra.mxu0 %v1777_v16  ;;  %v2401_v16 = vld [vmem:[#allocation4 + $0xf4] sm:$0xf0]  ;;  %v1860_v38 = vld [vmem:[#allocation4 + $0x128] sm:$0xf]  ;;  %v2431_v56 = vld [vmem:[#allocation4 + $0x1ec] sm:$0xf] }
  0x56   :  { %1139 = vmatpush.bf16.msra.mxu1 %v1905_v21  ;;  %v1829_v23 = vor.u32 %v2401_v16, %v1828_v15  ;;  %v2489_v9 = vld [vmem:[#allocation4 + $0x3b4] sm:$0xf0]  ;;  %v2036_v16 = vld [vmem:[#allocation4 + $0x288] sm:$0xf] }
  0x57   :  { %1152 = vmatpush.bf16.msra.mxu2 %v2033_v27  ;;  %v1812_v27 = vld [vmem:[#allocation4 + $0xc8] sm:$0xf]  ;;  %v2377_v37 = vld [vmem:[#allocation4 + $0x34] sm:$0xf0] }
  0x58   :  { %1165 = vmatpush.bf16.msra.mxu3 %v2161_v29 }
  0x59   :  { %1127 = vmatpush.bf16.msra.mxu0 %v1761_v28  ;;  %v2397_v28 = vld [vmem:[#allocation4 + $0xd4] sm:$0xf0] }
  0x5a   :  { %1140 = vmatpush.bf16.msra.mxu1 %v1889_v30  ;;  %v1940_v30 = vld [vmem:[#allocation4 + $0x1c8] sm:$0xf] }
  0x5b   :  { %1153 = vmatpush.bf16.msra.mxu2 %v2017_v40 }
  0x5c   :  { %1166 = vmatpush.bf16.msra.mxu3 %v2145_v42  ;;  %v1941_v42 = vor.u32 %v2429_v31, %v1940_v30  ;;  %v2020_v30 = vld [vmem:[#allocation4 + $0x268] sm:$0xf]  ;;  %v2449_v31 = vld [vmem:[#allocation4 + $0x274] sm:$0xf0] }
  0x5d   :  { %1128 = vmatpush.bf16.msra.mxu0 %v1745_v35 }
  0x5e   :  { %1141 = vmatpush.bf16.msra.mxu1 %v1873_v36  ;;  %v1813_v36 = vor.u32 %v2397_v28, %v1812_v27 }
  0x5f   :  { %1154 = vmatpush.bf16.msra.mxu2 %v2001_v52  ;;  %v2213_v52 = vor.u32 %v2497_v43, %v2212_v39  ;;  %v2409_v39 = vld [vmem:[#allocation4 + $0x134] sm:$0xf0] }
  0x60   :  { %1167 = vmatpush.bf16.msra.mxu3 %v2129_v54  ;;  %v2068_v54 = vld [vmem:[#allocation4 + $0x2c8] sm:$0xf]  ;;  %v2445_v43 = vld [vmem:[#allocation4 + $0x254] sm:$0xf0] }
  0x61   :  { %1129 = vmatpush.bf16.msra.mxu0 %v1729_v45  ;;  %v2393_v45 = vld [vmem:[#allocation4 + $0xb4] sm:$0xf0]  ;;  %v2069_v1 = vor.u32 %v2461_v55, %v2068_v54  ;;  %v1830_v55 = vld [vmem:[#allocation4 + $0xf8] sm:$0xf0] }
  0x62   :  { %1142 = vmatpush.bf16.msra.mxu1 %v1857_v48  ;;  %v2425_v48 = vld [vmem:[#allocation4 + $0x1b4] sm:$0xf0]  ;;  %v1797_v53 = vor.u32 %v2393_v45, %v1796_v44  ;;  %v2132_v44 = vld [vmem:[#allocation4 + $0x348] sm:$0xf] }
  0x63   :  { %1155 = vmatpush.bf16.msra.mxu2 %v1985_v63  ;;  %v2421_v63 = vld [vmem:[#allocation4 + $0x194] sm:$0xf0] }
  0x64   :  { %1168 = vmatpush.bf16.msra.mxu3 %v2113_v2  ;;  %v1909_v7 = vor.u32 %v2421_v63, %v1908_v62 }
  0x65   :  { %1130 = vmatpush.bf16.msra.mxu0 %v1713_v58  ;;  %v1925_v58 = vor.u32 %v2425_v48, %v1924_v47  ;;  %v2477_v47 = vld [vmem:[#allocation4 + $0x354] sm:$0xf0]  ;;  %v1716_v48 = vld [vmem:[#allocation4 + $0x8] sm:$0xf] }
  0x66   :  { %1143 = vmatpush.bf16.msra.mxu1 %v1841_v60  ;;  %v1780_v60 = vld [vmem:[#allocation4 + $0x88] sm:$0xf]  ;;  %v2133_v59 = vor.u32 %v2477_v47, %v2132_v44  ;;  %v2182_v47 = vld [vmem:[#allocation4 + $0x3b8] sm:$0xf0] }
  0x67   :  { %1156 = vmatpush.bf16.msra.mxu2 %v1969_v5  ;;  %v1781_v4 = vor.u32 %v2389_v61, %v1780_v60  ;;  %v2052_v5 = vld [vmem:[#allocation4 + $0x2a8] sm:$0xf]  ;;  %v2441_v61 = vld [vmem:[#allocation4 + $0x234] sm:$0xf0] }
  0x68   :  { %1169 = vmatpush.bf16.msra.mxu3 %v2097_v8  ;;  %v2180_v8 = vld [vmem:[#allocation4 + $0x3a8] sm:$0xf] }
  0x69   :  { %v2181_v15 = vor.u32 %v2489_v9, %v2180_v8  ;;  %v1988_v60 = vld [vmem:[#allocation4 + $0x228] sm:$0xf]  ;;  %v1942_v8 = vld [vmem:[#allocation4 + $0x1d8] sm:$0xf0] }
  0xa5   :  { %v242_v12 = vpop.f32.mrf.mxu0 }
  0xa6   :  { %v243_v13 = vadd.f32 %v242_v12, %v101_v10  ;;  %v255_v14 = vpop.f32.mrf.mxu1  ;;  %v1764_v10 = vld [vmem:[#allocation4 + $0x68] sm:$0xf] }
  0xa7   :  { %v256_v17 = vadd.f32 %v255_v14, %v102_v11  ;;  %v2385_v11 = vld [vmem:[#allocation4 + $0x74] sm:$0xf0]  ;;  %v1892_v12 = vld [vmem:[#allocation4 + $0x168] sm:$0xf]  ;;  %v2053_v14 = vor.u32 %v2457_v6, %v2052_v5  ;;  %v1989_v5 = vor.u32 %v2441_v61, %v1988_v60  ;;  %v1814_v6 = vld [vmem:[#allocation4 + $0xd8] sm:$0xf0] }
  0xa8   :  { %v285_v20 = vmax.f32 %v243_v13, 0.0  ;;  %v2417_v13 = vld [vmem:[#allocation4 + $0x174] sm:$0xf0]  ;;  %v1765_v18 = vor.u32 %v2385_v11, %v1764_v10  ;;  %v1972_v10 = vld [vmem:[#allocation4 + $0x208] sm:$0xf] }
  0xa9   :  { %v286_v21 = vmax.f32 %v256_v17, 0.0  ;;  %v2453_v17 = vld [vmem:[#allocation4 + $0x294] sm:$0xf0]  ;;  %v1893_v19 = vor.u32 %v2417_v13, %v1892_v12  ;;  %v2100_v12 = vld [vmem:[#allocation4 + $0x308] sm:$0xf] }
  0xaa   :  { %v2680_v24 = vpack.c.bf16 %v285_v20, %v285_v20  ;;  %v2164_v20 = vld [vmem:[#allocation4 + $0x388] sm:$0xf]  ;;  %v2037_v27 = vor.u32 %v2453_v17, %v2036_v16  ;;  %v2437_v11 = vld [vmem:[#allocation4 + $0x214] sm:$0xf0]  ;;  %v2483_v60 = vld [vmem:[#allocation4 + $0x38c] sm:$0xf] }
  0xab   :  { %v2682_v29 = vpack.c.bf16 %v286_v21, %v286_v21  ;;  %v2485_v21 = vld [vmem:[#allocation4 + $0x394] sm:$0xf0]  ;;  %v2166_v61 = vld [vmem:[#allocation4 + $0x398] sm:$0xf0] }
  0xac   :  { %1079 = vmatmul.bf16.vlgmr.msrb.gmra.mxu0 %v2680_v24  ;;  %v2165_v28 = vor.u32 %v2485_v21, %v2164_v20  ;;  %v2469_v13 = vld [vmem:[#allocation4 + $0x314] sm:$0xf0]  ;;  %v2391_v20 = vld [vmem:[#allocation4 + $0xac] sm:$0xf]  ;;  %v1973_v21 = vor.u32 %v2437_v11, %v1972_v10  ;;  %v1734_v11 = vld [vmem:[#allocation4 + $0x38] sm:$0xf0] }
  0xad   :  { %v268_v32 = vpop.f32.mrf.mxu2  ;;  %1092 = vmatmul.bf16.vlgmr.msrb.gmra.mxu1 %v2682_v29  ;;  %1175 = vmatpush.bf16.msrb.mxu0 %v1829_v23  ;;  %v244_v35 = vpop.f32.mrf.mxu0  ;;  %v2381_v23 = vld [vmem:[#allocation4 + $0x54] sm:$0xf0]  ;;  %v2375_v10 = vld [vmem:[#allocation4 + $0x2c] sm:$0xf] }
  0xae   :  { %v269_v33 = vadd.f32 %v268_v32, %v103_v22  ;;  %v281_v34 = vpop.f32.mrf.mxu3  ;;  %1188 = vmatpush.bf16.msrb.mxu1 %v1957_v26  ;;  %v257_v41 = vpop.f32.mrf.mxu1  ;;  %v1748_v22 = vld [vmem:[#allocation4 + $0x48] sm:$0xf]  ;;  %v2413_v26 = vld [vmem:[#allocation4 + $0x154] sm:$0xf0] }
  0xaf   :  { %v282_v40 = vadd.f32 %v281_v34, %v104_v25  ;;  %v1876_v25 = vld [vmem:[#allocation4 + $0x148] sm:$0xf]  ;;  %v1749_v32 = vor.u32 %v2381_v23, %v1748_v22  ;;  %v2481_v35 = vld [vmem:[#allocation4 + $0x374] sm:$0xf0]  ;;  %v1798_v22 = vld [vmem:[#allocation4 + $0xb8] sm:$0xf0] }
  0xb0   :  { %v287_v46 = vmax.f32 %v269_v33, 0.0  ;;  %v1877_v33 = vor.u32 %v2413_v26, %v1876_v25  ;;  %v2148_v34 = vld [vmem:[#allocation4 + $0x368] sm:$0xf]  ;;  %v2423_v23 = vld [vmem:[#allocation4 + $0x1ac] sm:$0xf]  ;;  %v2101_v26 = vor.u32 %v2469_v13, %v2100_v12 }
  0xb1   :  { %v288_v49 = vmax.f32 %v282_v40, 0.0  ;;  %1176 = vmatpush.bf16.msrb.mxu0 %v1813_v36  ;;  %v1732_v36 = vld [vmem:[#allocation4 + $0x28] sm:$0xf]  ;;  %v2021_v40 = vor.u32 %v2449_v31, %v2020_v30  ;;  %v2149_v41 = vor.u32 %v2481_v35, %v2148_v34  ;;  %v1926_v25 = vld [vmem:[#allocation4 + $0x1b8] sm:$0xf0] }
  0xb2   :  { %v2686_v51 = vpack.c.bf16 %v287_v46, %v287_v46  ;;  %1189 = vmatpush.bf16.msrb.mxu1 %v1941_v42  ;;  %v2004_v42 = vld [vmem:[#allocation4 + $0x248] sm:$0xf]  ;;  %v1733_v45 = vor.u32 %v2377_v37, %v1732_v36  ;;  %v1861_v46 = vor.u32 %v2409_v39, %v1860_v38  ;;  %v2459_v30 = vld [vmem:[#allocation4 + $0x2cc] sm:$0xf]  ;;  %v2070_v31 = vld [vmem:[#allocation4 + $0x2d8] sm:$0xf0] }
  0xb3   :  { %v2688_v57 = vpack.c.bf16 %v288_v49, %v288_v49  ;;  %v2373_v49 = vld [vmem:[#allocation4 + $0x14] sm:$0xf0]  ;;  %v2005_v54 = vor.u32 %v2445_v43, %v2004_v42  ;;  %v2491_v34 = vld [vmem:[#allocation4 + $0x3cc] sm:$0xf]  ;;  %v2198_v35 = vld [vmem:[#allocation4 + $0x3d8] sm:$0xf0] }
  0xb4   :  { %1105 = vmatmul.bf16.vlgmr.msrb.gmra.mxu2 %v2686_v51  ;;  %v1717_v62 = vor.u32 %v2373_v49, %v1716_v48  ;;  %v2387_v36 = vld [vmem:[#allocation4 + $0x8c] sm:$0xf]  ;;  %v1782_v37 = vld [vmem:[#allocation4 + $0x98] sm:$0xf0] }
  0xb5   :  { %1118 = vmatmul.bf16.vlgmr.msrb.gmra.mxu3 %v2688_v57  ;;  %1201 = vmatpush.bf16.msrb.mxu2 %v2085_v50  ;;  %v270_v0 = vpop.f32.mrf.mxu2  ;;  %v1844_v50 = vld [vmem:[#allocation4 + $0x108] sm:$0xf]  ;;  %v2419_v38 = vld [vmem:[#allocation4 + $0x18c] sm:$0xf]  ;;  %v1910_v39 = vld [vmem:[#allocation4 + $0x198] sm:$0xf0]  ;;  %v1785_v44 = vor.u32 %v2387_v36, %v1782_v37 }
  0xb6   :  { %1214 = vmatpush.bf16.msrb.mxu3 %v2213_v52  ;;  %v283_v2 = vpop.f32.mrf.mxu3  ;;  %1177 = vmatpush.bf16.msrb.mxu0 %v1797_v53  ;;  %v2405_v52 = vld [vmem:[#allocation4 + $0x114] sm:$0xf0]  ;;  %v2399_v53 = vld [vmem:[#allocation4 + $0xec] sm:$0xf]  ;;  %v2116_v0 = vld [vmem:[#allocation4 + $0x328] sm:$0xf] }
  0xb7   :  { %1190 = vmatpush.bf16.msrb.mxu1 %v1925_v58  ;;  %v1958_v58 = vld [vmem:[#allocation4 + $0x1f8] sm:$0xf0]  ;;  %v1845_v63 = vor.u32 %v2405_v52, %v1844_v50  ;;  %v1833_v2 = vor.u32 %v2399_v53, %v1830_v55  ;;  %v2455_v42 = vld [vmem:[#allocation4 + $0x2ac] sm:$0xf] }
  0xb8   :  { %v2054_v43 = vld [vmem:[#allocation4 + $0x2b8] sm:$0xf0]  ;;  %v2383_v48 = vld [vmem:[#allocation4 + $0x6c] sm:$0xf] }
  0xb9   :  { %1202 = vmatpush.bf16.msrb.mxu2 %v2069_v1  ;;  %v2473_v1 = vld [vmem:[#allocation4 + $0x334] sm:$0xf0]  ;;  %v1766_v49 = vld [vmem:[#allocation4 + $0x78] sm:$0xf0]  ;;  %v2415_v50 = vld [vmem:[#allocation4 + $0x16c] sm:$0xf]  ;;  %v2057_v53 = vor.u32 %v2455_v42, %v2054_v43 }
  0xba   :  { %1215 = vmatpush.bf16.msrb.mxu3 %v2197_v3  ;;  %1178 = vmatpush.bf16.msrb.mxu0 %v1781_v4  ;;  %v1961_v3 = vor.u32 %v2431_v56, %v1958_v58  ;;  %v2395_v4 = vld [vmem:[#allocation4 + $0xcc] sm:$0xf]  ;;  %v2117_v9 = vor.u32 %v2473_v1, %v2116_v0  ;;  %v1894_v52 = vld [vmem:[#allocation4 + $0x178] sm:$0xf0]  ;;  %v1769_v58 = vor.u32 %v2383_v48, %v1766_v49  ;;  %v2504_v43 = vld [vmem:[#allocation6 + $0x30] sm:$0xff] }
  0xbb   :  { %1191 = vmatpush.bf16.msrb.mxu1 %v1909_v7  ;;  %v2427_v7 = vld [vmem:[#allocation4 + $0x1cc] sm:$0xf]  ;;  %v1817_v16 = vor.u32 %v2395_v4, %v1814_v6  ;;  %v2038_v56 = vld [vmem:[#allocation4 + $0x298] sm:$0xf0] }
  0xbc   :  { %1131 = vmatmul.bf16.vlgmr.msra.gmra.mxu0 %v2680_v24  ;;  %v1945_v17 = vor.u32 %v2427_v7, %v1942_v8  ;;  %v2451_v55 = vld [vmem:[#allocation4 + $0x28c] sm:$0xf]  ;;  %v1878_v1 = vld [vmem:[#allocation4 + $0x158] sm:$0xf0] }
  0xbd   :  { %1203 = vmatpush.bf16.msrb.mxu2 %v2053_v14  ;;  %1144 = vmatmul.bf16.vlgmr.msra.gmra.mxu1 %v2682_v29  ;;  %v2463_v14 = vld [vmem:[#allocation4 + $0x2ec] sm:$0xf]  ;;  %v1862_v13 = vld [vmem:[#allocation4 + $0x138] sm:$0xf0] }
  0xbe   :  { %1216 = vmatpush.bf16.msrb.mxu3 %v2181_v15  ;;  %1179 = vmatpush.bf16.msrb.mxu0 %v1765_v18  ;;  %v2086_v15 = vld [vmem:[#allocation4 + $0x2f8] sm:$0xf0]  ;;  %v2495_v18 = vld [vmem:[#allocation4 + $0x3ec] sm:$0xf] }
  0xbf   :  { %1192 = vmatpush.bf16.msrb.mxu1 %v1893_v19  ;;  %v2214_v19 = vld [vmem:[#allocation4 + $0x3f8] sm:$0xf0]  ;;  %v2411_v0 = vld [vmem:[#allocation4 + $0x14c] sm:$0xf] }
  0xc0   :  { %v2447_v4 = vld [vmem:[#allocation4 + $0x26c] sm:$0xf]  ;;  %v1881_v7 = vor.u32 %v2411_v0, %v1878_v1  ;;  %v2505_v36 = vld [vmem:[#allocation6 + $0x38] sm:$0xff]  ;;  %v2506_v0 = vld [vmem:[#allocation6 + $0x40] sm:$0xff] }
  0xc1   :  { %1204 = vmatpush.bf16.msrb.mxu2 %v2037_v27  ;;  %v2089_v27 = vor.u32 %v2463_v14, %v2086_v15  ;;  %v2479_v8 = vld [vmem:[#allocation4 + $0x36c] sm:$0xf]  ;;  %v2102_v42 = vld [vmem:[#allocation4 + $0x318] sm:$0xf0]  ;;  %v2518_v1 = vld [vmem:[#allocation6 + $0xa0] sm:$0xff] }
  0xc2   :  { %1217 = vmatpush.bf16.msrb.mxu3 %v2165_v28  ;;  %1180 = vmatpush.bf16.msrb.mxu0 %v1749_v32  ;;  %v2217_v28 = vor.u32 %v2495_v18, %v2214_v19  ;;  %v1801_v32 = vor.u32 %v2391_v20, %v1798_v22  ;;  %v2407_v12 = vld [vmem:[#allocation4 + $0x12c] sm:$0xf]  ;;  %v1737_v18 = vor.u32 %v2375_v10, %v1734_v11  ;;  %v2513_v48 = vld [vmem:[#allocation6 + $0x78] sm:$0xff] }
  0xc3   :  { %1193 = vmatpush.bf16.msrb.mxu1 %v1877_v33  ;;  %v1929_v33 = vor.u32 %v2423_v23, %v1926_v25  ;;  %v1865_v19 = vor.u32 %v2407_v12, %v1862_v13  ;;  %v2475_v20 = vld [vmem:[#allocation4 + $0x34c] sm:$0xf]  ;;  %v1718_v23 = vld [vmem:[#allocation4 + $0x18] sm:$0xf0] }
  0xc4   :  { %1157 = vmatmul.bf16.vlgmr.msra.gmra.mxu2 %v2686_v51  ;;  %v2371_v22 = vld [vmem:[#allocation4 + $0xc] sm:$0xf]  ;;  %v2501_v49 = vld [vmem:[#allocation6 + $0x18] sm:$0xff] }
  0xc5   :  { %1170 = vmatmul.bf16.vlgmr.msra.gmra.mxu3 %v2688_v57  ;;  %1205 = vmatpush.bf16.msrb.mxu2 %v2021_v40  ;;  %v2073_v40 = vor.u32 %v2459_v30, %v2070_v31  ;;  %v2403_v25 = vld [vmem:[#allocation4 + $0x10c] sm:$0xf]  ;;  %v1990_v31 = vld [vmem:[#allocation4 + $0x238] sm:$0xf0] }
  0xc6   :  { %1218 = vmatpush.bf16.msrb.mxu3 %v2149_v41  ;;  %1181 = vmatpush.bf16.msrb.mxu0 %v1733_v45  ;;  %v2201_v41 = vor.u32 %v2491_v34, %v2198_v35  ;;  %v1913_v45 = vor.u32 %v2419_v38, %v1910_v39  ;;  %v2439_v30 = vld [vmem:[#allocation4 + $0x22c] sm:$0xf]  ;;  %v2118_v35 = vld [vmem:[#allocation4 + $0x338] sm:$0xf0] }
  0xc7   :  { %1194 = vmatpush.bf16.msrb.mxu1 %v1861_v46  ;;  %v2487_v46 = vld [vmem:[#allocation4 + $0x3ac] sm:$0xf]  ;;  %v1993_v37 = vor.u32 %v2439_v30, %v1990_v31 }
  0xc8   :  { %v2471_v34 = vld [vmem:[#allocation4 + $0x32c] sm:$0xf] }
  0xc9   :  { %1206 = vmatpush.bf16.msrb.mxu2 %v2005_v54  ;;  %v2185_v54 = vor.u32 %v2487_v46, %v2182_v47  ;;  %v2121_v38 = vor.u32 %v2471_v34, %v2118_v35  ;;  %v2435_v39 = vld [vmem:[#allocation4 + $0x20c] sm:$0xf]  ;;  %v2502_v47 = vld [vmem:[#allocation6 + $0x20] sm:$0xff] }
  0xca   :  { %1219 = vmatpush.bf16.msrb.mxu3 %v2133_v59  ;;  %1182 = vmatpush.bf16.msrb.mxu0 %v1717_v62  ;;  %v1897_v59 = vor.u32 %v2415_v50, %v1894_v52  ;;  %v2379_v62 = vld [vmem:[#allocation4 + $0x4c] sm:$0xf]  ;;  %v2500_v50 = vld [vmem:[#allocation6 + $0x10] sm:$0xff] }
  0xcb   :  { %1195 = vmatpush.bf16.msrb.mxu1 %v1845_v63  ;;  %v1750_v63 = vld [vmem:[#allocation4 + $0x58] sm:$0xf0]  ;;  %v2503_v46 = vld [vmem:[#allocation6 + $0x28] sm:$0xff] }
  0xcc   :  { %v1753_v6 = vor.u32 %v2379_v62, %v1750_v63  ;;  %v2511_v52 = vld [vmem:[#allocation6 + $0x68] sm:$0xff] }
  0xcd   :  { %1207 = vmatpush.bf16.msrb.mxu2 %v1989_v5  ;;  %1183 = vmatmul.bf16.vlgmr.msrb.gmra.mxu0 %v2680_v24  ;;  %v2022_v5 = vld [vmem:[#allocation4 + $0x278] sm:$0xf0]  ;;  %v2515_v11 = vld [vmem:[#allocation6 + $0x88] sm:$0xff] }
  0xce   :  { %1227 = vmatpush.bf16.msra.mxu0 %v1833_v2  ;;  %1220 = vmatpush.bf16.msrb.mxu3 %v2117_v9  ;;  %v2041_v2 = vor.u32 %v2451_v55, %v2038_v56  ;;  %v2150_v9 = vld [vmem:[#allocation4 + $0x378] sm:$0xf0]  ;;  %v2025_v14 = vor.u32 %v2447_v4, %v2022_v5  ;;  %v2508_v55 = vld [vmem:[#allocation6 + $0x50] sm:$0xff] }
  0xcf   :  { %1240 = vmatpush.bf16.msra.mxu1 %v1961_v3  ;;  %v2169_v3 = vor.u32 %v2483_v60, %v2166_v61  ;;  %v2153_v15 = vor.u32 %v2479_v8, %v2150_v9  ;;  %v2520_v56 = vld [vmem:[#allocation6 + $0xb0] sm:$0xff]  ;;  %v2519_v60 = vld [vmem:[#allocation6 + $0xa8] sm:$0xff] }
  0xd0   :  { %1196 = vmatmul.bf16.vlgmr.msrb.gmra.mxu1 %v2682_v29 }
  0xd1   :  { %1208 = vmatpush.bf16.msrb.mxu2 %v1973_v21  ;;  %v2134_v21 = vld [vmem:[#allocation4 + $0x358] sm:$0xf0] }
  0xd2   :  { %1228 = vmatpush.bf16.msra.mxu0 %v1817_v16  ;;  %1221 = vmatpush.bf16.msrb.mxu3 %v2101_v26  ;;  %v2443_v16 = vld [vmem:[#allocation4 + $0x24c] sm:$0xf]  ;;  %v1846_v26 = vld [vmem:[#allocation4 + $0x118] sm:$0xf0] }
  0xd3   :  { %1241 = vmatpush.bf16.msra.mxu1 %v1945_v17  ;;  %v2006_v17 = vld [vmem:[#allocation4 + $0x258] sm:$0xf0] }
  0xd4   :  { %1209 = vmatmul.bf16.vlgmr.msrb.gmra.mxu2 %v2686_v51 }
  0xd5   :  { %1253 = vmatpush.bf16.msra.mxu2 %v2089_v27  ;;  %1222 = vmatmul.bf16.vlgmr.msrb.gmra.mxu3 %v2688_v57  ;;  %v2009_v27 = vor.u32 %v2443_v16, %v2006_v17  ;;  %v2514_v16 = vld [vmem:[#allocation6 + $0x80] sm:$0xff]  ;;  %v2529_v17 = vld [vmem:[#allocation6 + $0xf8] sm:$0xff] }
  0xd6   :  { %1266 = vmatpush.bf16.msra.mxu3 %v2217_v28  ;;  %1229 = vmatpush.bf16.msra.mxu0 %v1801_v32  ;;  %v2137_v28 = vor.u32 %v2475_v20, %v2134_v21  ;;  %v1721_v32 = vor.u32 %v2371_v22, %v1718_v23  ;;  %v2528_v22 = vld [vmem:[#allocation6 + $0xf0] sm:$0xff] }
  0xd7   :  { %1242 = vmatpush.bf16.msra.mxu1 %v1929_v33  ;;  %v1849_v33 = vor.u32 %v2403_v25, %v1846_v26 }
  0xd9   :  { %1254 = vmatpush.bf16.msra.mxu2 %v2073_v40  ;;  %v1974_v40 = vld [vmem:[#allocation4 + $0x218] sm:$0xf0] }
  0xda   :  { %1267 = vmatpush.bf16.msra.mxu3 %v2201_v41  ;;  %1230 = vmatpush.bf16.msra.mxu0 %v1785_v44  ;;  %v2467_v41 = vld [vmem:[#allocation4 + $0x30c] sm:$0xf]  ;;  %v1977_v44 = vor.u32 %v2435_v39, %v1974_v40 }
  0xdb   :  { %1243 = vmatpush.bf16.msra.mxu1 %v1913_v45  ;;  %v2105_v45 = vor.u32 %v2467_v41, %v2102_v42 }
  0xdd   :  { %1255 = vmatpush.bf16.msra.mxu2 %v2057_v53  ;;  %v2498_v53 = vld [vmem:[#allocation6] sm:$0xff] }
  0xde   :  { %1268 = vmatpush.bf16.msra.mxu3 %v2185_v54  ;;  %1231 = vmatpush.bf16.msra.mxu0 %v1769_v58  ;;  %v2510_v54 = vld [vmem:[#allocation6 + $0x60] sm:$0xff] }
  0xdf   :  { %1244 = vmatpush.bf16.msra.mxu1 %v1897_v59  ;;  %v2707_v58 = vld [vmem:[%s2723_s4] sm:$0xf]  ;;  %v2507_v59 = vld [vmem:[#allocation6 + $0x48] sm:$0xff] }
  0xe0   :  { %v423_v63 = vperm.slane %v2707_v58, 0  ;;  %v425_v40 = vperm.slane %v2707_v58, 2 }
  0xe1   :  { %1256 = vmatpush.bf16.msra.mxu2 %v2041_v2 }
  0xe2   :  { %1269 = vmatpush.bf16.msra.mxu3 %v2169_v3  ;;  %1232 = vmatpush.bf16.msra.mxu0 %v1753_v6  ;;  %v2517_v3 = vld [vmem:[#allocation6 + $0x98] sm:$0xff] }
  0xe3   :  { %1245 = vmatpush.bf16.msra.mxu1 %v1881_v7  ;;  %v2516_v7 = vld [vmem:[#allocation6 + $0x90] sm:$0xff] }
  0xe5   :  { %1257 = vmatpush.bf16.msra.mxu2 %v2025_v14 }
  0xe6   :  { %1270 = vmatpush.bf16.msra.mxu3 %v2153_v15  ;;  %1233 = vmatpush.bf16.msra.mxu0 %v1737_v18 }
  0xe7   :  { %1246 = vmatpush.bf16.msra.mxu1 %v1865_v19  ;;  %v424_v19 = vperm.slane %v2707_v58, 1 }
  0xe9   :  { %1258 = vmatpush.bf16.msra.mxu2 %v2009_v27  ;;  %v2527_v27 = vld [vmem:[#allocation6 + $0xe8] sm:$0xff] }
  0xea   :  { %1271 = vmatpush.bf16.msra.mxu3 %v2137_v28  ;;  %1234 = vmatpush.bf16.msra.mxu0 %v1721_v32 }
  0xeb   :  { %1247 = vmatpush.bf16.msra.mxu1 %v1849_v33  ;;  %v2526_v33 = vld [vmem:[#allocation6 + $0xe0] sm:$0xff] }
  0xed   :  { %1259 = vmatpush.bf16.msra.mxu2 %v1993_v37  ;;  %1235 = vmatmul.bf16.vlgmr.msra.gmra.mxu0 %v2680_v24  ;;  %v2512_v24 = vld [vmem:[#allocation6 + $0x70] sm:$0xff] }
  0xee   :  { %1547 = vmatpush.bf16.msrb.mxu0 %v2505_v36  ;;  %1272 = vmatpush.bf16.msra.mxu3 %v2121_v38  ;;  %v2525_v36 = vld [vmem:[#allocation6 + $0xd8] sm:$0xff] }
  0xef   :  { %1248 = vmatmul.bf16.vlgmr.msra.gmra.mxu1 %v2682_v29  ;;  %v2499_v29 = vld [vmem:[#allocation6 + $0x8] sm:$0xff] }
  0xf0   :  { %1560 = vmatpush.bf16.msrb.mxu1 %v2513_v48 }
  0xf1   :  { %1260 = vmatpush.bf16.msra.mxu2 %v1977_v44 }
  0xf2   :  { %1548 = vmatpush.bf16.msrb.mxu0 %v2504_v43  ;;  %1273 = vmatpush.bf16.msra.mxu3 %v2105_v45  ;;  %v2524_v43 = vld [vmem:[#allocation6 + $0xd0] sm:$0xff] }
  0xf4   :  { %1261 = vmatmul.bf16.vlgmr.msra.gmra.mxu2 %v2686_v51  ;;  %1561 = vmatpush.bf16.msrb.mxu1 %v2512_v24  ;;  %v2509_v51 = vld [vmem:[#allocation6 + $0x58] sm:$0xff] }
  0xf5   :  { %1274 = vmatmul.bf16.vlgmr.msra.gmra.mxu3 %v2688_v57  ;;  %v2521_v57 = vld [vmem:[#allocation6 + $0xb8] sm:$0xff] }
  0xf6   :  { %1549 = vmatpush.bf16.msrb.mxu0 %v2503_v46  ;;  %1573 = vmatpush.bf16.msrb.mxu2 %v2521_v57 }
  0xf7   :  { %1586 = vmatpush.bf16.msrb.mxu3 %v2529_v17 }
  0xf8   :  { %1562 = vmatpush.bf16.msrb.mxu1 %v2511_v52 }
  0xfa   :  { %1550 = vmatpush.bf16.msrb.mxu0 %v2502_v47  ;;  %1574 = vmatpush.bf16.msrb.mxu2 %v2520_v56  ;;  %v2523_v47 = vld [vmem:[#allocation6 + $0xc8] sm:$0xff] }
  0xfb   :  { %1587 = vmatpush.bf16.msrb.mxu3 %v2528_v22 }
  0xfc   :  { %1563 = vmatpush.bf16.msrb.mxu1 %v2510_v54 }
  0xfe   :  { %1551 = vmatpush.bf16.msrb.mxu0 %v2501_v49  ;;  %1575 = vmatpush.bf16.msrb.mxu2 %v2519_v60 }
  0xff   :  { %1588 = vmatpush.bf16.msrb.mxu3 %v2527_v27 }
 0x100   :  { %1564 = vmatpush.bf16.msrb.mxu1 %v2509_v51 }
 0x102   :  { %1552 = vmatpush.bf16.msrb.mxu0 %v2500_v50  ;;  %1576 = vmatpush.bf16.msrb.mxu2 %v2518_v1 }
 0x103   :  { %1589 = vmatpush.bf16.msrb.mxu3 %v2526_v33 }
 0x104   :  { %1565 = vmatpush.bf16.msrb.mxu1 %v2508_v55 }
 0x106   :  { %1553 = vmatpush.bf16.msrb.mxu0 %v2499_v29  ;;  %1577 = vmatpush.bf16.msrb.mxu2 %v2517_v3  ;;  %v2522_v29 = vld [vmem:[#allocation6 + $0xc0] sm:$0xff] }
 0x107   :  { %1590 = vmatpush.bf16.msrb.mxu3 %v2525_v36 }
 0x108   :  { %1566 = vmatpush.bf16.msrb.mxu1 %v2507_v59  ;;  %v426_v59 = vperm.slane %v2707_v58, 3  ;;  %v2537_v58 = vld [vmem:[%s2725_s6] ss:$0 sm:$0xff] }
 0x10a   :  { %1554 = vmatpush.bf16.msrb.mxu0 %v2498_v53  ;;  %1578 = vmatpush.bf16.msrb.mxu2 %v2516_v7 }
 0x10b   :  { %1591 = vmatpush.bf16.msrb.mxu3 %v2524_v43 }
 0x10c   :  { %1567 = vmatpush.bf16.msrb.mxu1 %v2506_v0 }
 0x10e   :  { %1579 = vmatpush.bf16.msrb.mxu2 %v2515_v11 }
 0x10f   :  { %1592 = vmatpush.bf16.msrb.mxu3 %v2523_v47 }
 0x112   :  { %1580 = vmatpush.bf16.msrb.mxu2 %v2514_v16 }
 0x113   :  { %1593 = vmatpush.bf16.msrb.mxu3 %v2522_v29 }
 0x129   :  { %v1080_v61 = vpop.f32.mrf.mxu0 }
 0x12a   :  { %v1093_v62 = vpop.f32.mrf.mxu1  ;;  %v1081_v2 = vadd.f32 %v1080_v61, %v423_v63 }
 0x12c   :  { %v1094_v6 = vadd.f32 %v1093_v62, %v1081_v2 }
 0x131   :  { %v1082_v4 = vpop.f32.mrf.mxu0 }
 0x132   :  { %v1095_v5 = vpop.f32.mrf.mxu1 }
 0x137   :  { %v1106_v8 = vpop.f32.mrf.mxu2 }
 0x138   :  { %v1107_v9 = vadd.f32 %v1106_v8, %v1094_v6  ;;  %v1119_v10 = vpop.f32.mrf.mxu3 }
 0x139   :  { %v1132_v13 = vpop.f32.mrf.mxu0 }
 0x13a   :  { %v1120_v12 = vadd.f32 %v1119_v10, %v1107_v9  ;;  %v1145_v14 = vpop.f32.mrf.mxu1  ;;  %v1133_v23 = vadd.f32 %v1132_v13, %v424_v19 }
 0x13c   :  { %v1279_v15 = vmax.f32 %v1120_v12, 0.0  ;;  %v1146_v28 = vadd.f32 %v1145_v14, %v1133_v23 }
 0x13e   :  { %v1283_v18 = vpack.c.bf16 %v1279_v15, %v1279_v15 }
 0x13f   :  { %v1108_v20 = vpop.f32.mrf.mxu2 }
 0x140   :  { %v1121_v21 = vpop.f32.mrf.mxu3  ;;  %1555 = vmatmul.bf16.vlgmr.msrb.gmra.mxu0 %v1283_v18 }
 0x141   :  { %v1134_v25 = vpop.f32.mrf.mxu0 }
 0x142   :  { %v1147_v26 = vpop.f32.mrf.mxu1 }
 0x147   :  { %v1158_v30 = vpop.f32.mrf.mxu2 }
 0x148   :  { %v1159_v31 = vadd.f32 %v1158_v30, %v1146_v28  ;;  %v1171_v32 = vpop.f32.mrf.mxu3 }
 0x14a   :  { %v1172_v34 = vadd.f32 %v1171_v32, %v1159_v31  ;;  %v1184_v35 = vpop.f32.mrf.mxu0 }
 0x14b   :  { %v1185_v44 = vadd.f32 %v1184_v35, %v425_v40 }
 0x14c   :  { %v1280_v37 = vmax.f32 %v1172_v34, 0.0 }
 0x14d   :  { %v1197_v38 = vpop.f32.mrf.mxu1 }
 0x14e   :  { %v1284_v39 = vpack.c.bf16 %v1280_v37, %v1280_v37  ;;  %v1198_v48 = vadd.f32 %v1197_v38, %v1185_v44 }
 0x14f   :  { %v1160_v41 = vpop.f32.mrf.mxu2 }
 0x150   :  { %v1173_v42 = vpop.f32.mrf.mxu3  ;;  %1568 = vmatmul.bf16.vlgmr.msrb.gmra.mxu1 %v1284_v39 }
 0x152   :  { %v1186_v45 = vpop.f32.mrf.mxu0 }
 0x155   :  { %v1199_v46 = vpop.f32.mrf.mxu1 }
 0x157   :  { %v1210_v49 = vpop.f32.mrf.mxu2 }
 0x158   :  { %v1223_v50 = vpop.f32.mrf.mxu3  ;;  %v1211_v24 = vadd.f32 %v1210_v49, %v1198_v48 }
 0x15a   :  { %v1224_v52 = vadd.f32 %v1223_v50, %v1211_v24 }
 0x15c   :  { %v1281_v53 = vmax.f32 %v1224_v52, 0.0 }
 0x15e   :  { %v1285_v54 = vpack.c.bf16 %v1281_v53, %v1281_v53 }
 0x15f   :  { %v1212_v51 = vpop.f32.mrf.mxu2 }
 0x160   :  { %v1225_v57 = vpop.f32.mrf.mxu3  ;;  %1581 = vmatmul.bf16.vlgmr.msrb.gmra.mxu2 %v1285_v54 }
 0x16a   :  { %v1236_v55 = vpop.f32.mrf.mxu0 }
 0x16b   :  { %v1237_v60 = vadd.f32 %v1236_v55, %v426_v59 }
 0x16c   :  { %v1249_v56 = vpop.f32.mrf.mxu1 }
 0x16d   :  { %v1250_v63 = vadd.f32 %v1249_v56, %v1237_v60 }
 0x172   :  { %v1238_v61 = vpop.f32.mrf.mxu0 }
 0x174   :  { %v1251_v62 = vpop.f32.mrf.mxu1 }
 0x177   :  { %v1262_v0 = vpop.f32.mrf.mxu2 }
 0x178   :  { %v1263_v1 = vadd.f32 %v1262_v0, %v1250_v63  ;;  %v1275_v2 = vpop.f32.mrf.mxu3 }
 0x17a   :  { %v1276_v3 = vadd.f32 %v1275_v2, %v1263_v1 }
 0x17c   :  { %v1282_v4 = vmax.f32 %v1276_v3, 0.0 }
 0x17e   :  { %v1286_v5 = vpack.c.bf16 %v1282_v4, %v1282_v4 }
 0x17f   :  { %v1264_v6 = vpop.f32.mrf.mxu2 }
 0x180   :  { %v1277_v7 = vpop.f32.mrf.mxu3  ;;  %1594 = vmatmul.bf16.vlgmr.msrb.gmra.mxu3 %v1286_v5 }
 0x1bd   :  { %v1556_v8 = vpop.f32.mrf.mxu0 }
 0x1be   :  { %v1557_v14 = vadd.f32 %v2537_v58, %v1556_v8 }
 0x1c5   :  { %v1558_v9 = vpop.f32.mrf.mxu0 }
 0x1cd   :  { %v1569_v10 = vpop.f32.mrf.mxu1 }
 0x1ce   :  { %v1570_v15 = vadd.f32 %v1569_v10, %v1557_v14 }
 0x1d5   :  { %v1571_v11 = vpop.f32.mrf.mxu1 }
 0x1e3   :  { %v1582_v12 = vpop.f32.mrf.mxu2 }
 0x1e4   :  { %v1583_v16 = vadd.f32 %v1582_v12, %v1570_v15 }
 0x1eb   :  { %v1584_v13 = vpop.f32.mrf.mxu2 }
 0x203   :  { %v1595_v17 = vpop.f32.mrf.mxu3 }
 0x204   :  { %v1596_v18 = vadd.f32 %v1595_v17, %v1583_v16 }
 0x206   :  { %1599 = vst [vmem:[%s2726_s7] sm:$0xff] %v1596_v18 }
 0x20b   :  { %v1597_v19 = vpop.f32.mrf.mxu3 }
 0x20c   :  { %1604 = vsyncpa [#allocation3], 1 }
 0x20d   :  { %1605 = vsyncpa [#allocation5], 1 }

</bundles_post_ra>
